<compile_context>
chip_gen: v7x
topology: tpu7x:2x2x1
jax: 0.10.0
libtpu: 0.0.40
codegen_flags: <defaults>
</compile_context>

<pallas_src>
import functools

import jax
import jax.numpy as jnp
from jax.experimental import pallas as pl
from jax.experimental.pallas import tpu as pltpu

LANE = 128
MAX_TILE_ROWS = 2048  # rows of 128 lanes per block per channel (multiple of 8)


def _tp_partial_kernel(x_ref, t_ref, out_ref):
    """Per-(batch-block, row-tile) partial TP sums, stored as an (8,128) strip."""
    x = x_ref[...]                        # (BN, 3, TR, 128) float32 logits
    t = t_ref[...]                        # (BN, 3, TR, 128) int8 reshape-aligned mask

    # Channel slabs (leading, non-tiled axis -> free views); softmax over the
    # 3 channels is pure elementwise VPU max/sub/add + EUP exp/recip.
    x0, x1, x2 = x[:, 0], x[:, 1], x[:, 2]
    m = jnp.maximum(jnp.maximum(x0, x1), x2)
    e0 = jnp.exp(x0 - m)
    e1 = jnp.exp(x1 - m)
    e2 = jnp.exp(x2 - m)
    denom = e0 + e1 + e2

    zero = jnp.float32(0.0)
    numer = (jnp.where(t[:, 0] != 0, e0, zero)
             + jnp.where(t[:, 1] != 0, e1, zero)
             + jnp.where(t[:, 2] != 0, e2, zero))

    tp_pix = numer * pl.reciprocal(denom)             # (BN, TR, 128)

    # Reduce batch-block axis (elementwise adds), then fold rows into strips
    # of 8 sublanes.  The final 8->1 / 128->1 reductions happen in the wrapper.
    tp_rows = jnp.sum(tp_pix, axis=0)                 # (TR, 128)
    tr = tp_rows.shape[0]
    tp_strip = jnp.sum(tp_rows.reshape(tr // 8, 8, LANE), axis=0)   # (8, 128)

    out_ref[...] = tp_strip[None, None]               # (1, 1, 8, 128) slot


@functools.partial(jax.jit, static_argnames=("smooth", "alpha", "beta", "gamma"))
def focal_tversky_loss(inputs, targets, smooth=1.0, alpha=0.5, beta=0.5, gamma=1.0):
    """inputs: (N, C=3, H, W) float32 logits (NCHW, like PyTorch).
       targets: (N, H, W) integer labels in {0, 1, 2}."""
    N, C, H, W = inputs.shape
    assert C == 3, "FocalTverskyLoss (via mask2rgb) requires C == 3"
    HW = H * W

    inputs = inputs.astype(jnp.float32)

    # mask2rgb: class 1 -> channel 0, class 2 -> channel 1, class 0 -> zeros.
    one_hot = jnp.stack(
        [(targets == 1), (targets == 2), jnp.zeros_like(targets, dtype=bool)],
        axis=-1,
    )                                                       # (N, H, W, 3) bool

    # PyTorch's .view(-1) pairing of the NCHW softmax with the NHWC one-hot is
    # a pure reshape of the one-hot to (N, C, HW) -- no transpose.
    t3 = one_hot.reshape(N, C, HW).astype(jnp.int8)         # (N, 3, HW) int8
    x3 = inputs.reshape(N, C, HW)                           # (N, 3, HW) f32

    # CNT (= sum of the one-hot mask) computed exactly from the raw labels;
    # the kernel no longer accumulates it.
    cnt = jnp.sum((targets == 1) | (targets == 2)).astype(jnp.float32)

    # ---- tiling ---------------------------------------------------------
    R_raw = -(-HW // LANE)                                  # rows of 128 lanes
    if R_raw <= MAX_TILE_ROWS:
        R_img = ((R_raw + 7) // 8) * 8       # fill native f32 (8,128) tiles
        TR = R_img                           # full row extent per image
        bn_cap = max(1, min(N, MAX_TILE_ROWS // R_img))
        n_blocks = -(-N // bn_cap)           # balance batch padding
        BN = -(-N // n_blocks)
    else:
        R_img = ((R_raw + MAX_TILE_ROWS - 1) // MAX_TILE_ROWS) * MAX_TILE_ROWS
        TR = MAX_TILE_ROWS
        n_blocks = -(-N // 1)
        BN = 1
    N_pad = n_blocks * BN if R_raw <= MAX_TILE_ROWS else N
    HW_pad = R_img * LANE

    # ONE consolidated pad per array (batch + pixel padding together).
    if (N_pad, HW_pad) != (N, HW):
        x3 = jnp.pad(x3, ((0, N_pad - N), (0, 0), (0, HW_pad - HW)))
        t3 = jnp.pad(t3, ((0, N_pad - N), (0, 0), (0, HW_pad - HW)))
    x4 = x3.reshape(N_pad, C, R_img, LANE)
    t4 = t3.reshape(N_pad, C, R_img, LANE)

    grid = (N_pad // BN, R_img // TR)

    partials = pl.pallas_call(
        _tp_partial_kernel,
        out_shape=jax.ShapeDtypeStruct((grid[0], grid[1], 8, LANE), jnp.float32),
        grid_spec=pltpu.PrefetchScalarGridSpec(
            num_scalar_prefetch=0,
            grid=grid,
            in_specs=[
                pl.BlockSpec((BN, C, TR, LANE), lambda nb, r: (nb, 0, r, 0)),
                pl.BlockSpec((BN, C, TR, LANE), lambda nb, r: (nb, 0, r, 0)),
            ],
            # Per-step output slot -> no resident accumulator, both grid axes
            # can be sharded across TensorCores on v7x.
            out_specs=pl.BlockSpec((1, 1, 8, LANE), lambda nb, r: (nb, r, 0, 0)),
        ),
        compiler_params=pltpu.CompilerParams(
            dimension_semantics=("parallel", "parallel"),
            vmem_limit_bytes=32 * 1024 * 1024,
        ),
    )(x4, t4)

    tp = jnp.sum(partials)
    total = jnp.float32(N) * jnp.float32(HW)   # sum of all softmax values
    fp = total - tp                            # sum((1 - t) * soft)
    fn = cnt - tp                              # sum(t * (1 - soft))
    tversky = (tp + smooth) / (tp + alpha * fp + beta * fn + smooth)
    return jnp.maximum(1.0 - tversky, 0.0) ** gamma


if __name__ == "__main__":
    key = jax.random.PRNGKey(0)
    k1, k2 = jax.random.split(key)
    N, C, H, W = 2, 3, 16, 16
    inputs = jax.random.normal(k1, (N, C, H, W), dtype=jnp.float32)
    targets = jax.random.randint(k2, (N, H, W), 0, 3, dtype=jnp.int32)

    loss = focal_tversky_loss(inputs, targets)
    loss = jax.block_until_ready(loss)

    # Pure-JAX reference reproducing the PyTorch forward exactly.
    soft = jax.nn.softmax(inputs, axis=1)
    one_hot = jnp.stack(
        [(targets == 1), (targets == 2), jnp.zeros_like(targets, dtype=bool)],
        axis=-1,
    ).astype(jnp.float32)
    a = soft.reshape(-1)
    b = one_hot.reshape(-1)
    TP = jnp.sum(a * b)
    FP = jnp.sum((1.0 - b) * a)
    FN = jnp.sum(b * (1.0 - a))
    tversky = (TP + 1.0) / (TP + 0.5 * FP + 0.5 * FN + 1.0)
    ref = (1.0 - tversky) ** 1.0

    assert jnp.allclose(loss, ref, rtol=1e-5, atol=1e-6), (loss, ref)
    print("KERNEL_OK")
</pallas_src>

<mosaic_0001>
module attributes {stable_mosaic.version = 11 : i64} {
  func.func @_tp_partial_kernel(%arg0: i32, %arg1: i32, %arg2: memref<2x3x8x128xf32, #tpu.memory_space<vmem>>, %arg3: memref<2x3x8x128xi8, #tpu.memory_space<vmem>>, %arg4: memref<1x1x8x128xf32, #tpu.memory_space<vmem>>) attributes {dimension_semantics = [#tpu.dimension_semantics<parallel>, #tpu.dimension_semantics<parallel>], iteration_bounds = array<i64: 1, 1>, scalar_prefetch = 0 : i64, scratch_operands = 0 : i64, tpu.core_type = #tpu.core_type<tc>, window_params = [{transform_indices = @transform_0, window_bounds = array<i64: 2, 3, 8, 128>}, {transform_indices = @transform_1, window_bounds = array<i64: 2, 3, 8, 128>}, {transform_indices = @transform_2, window_bounds = array<i64: 1, 1, 8, 128>}]} {
    %c0 = arith.constant 0 : index
    %c0_0 = arith.constant 0 : index
    %c0_1 = arith.constant 0 : index
    %c0_2 = arith.constant 0 : index
    %0 = vector.load %arg2[%c0, %c0_0, %c0_1, %c0_2] : memref<2x3x8x128xf32, #tpu.memory_space<vmem>>, vector<2x3x8x128xf32>
    %c0_3 = arith.constant 0 : index
    %c0_4 = arith.constant 0 : index
    %c0_5 = arith.constant 0 : index
    %c0_6 = arith.constant 0 : index
    %1 = vector.load %arg3[%c0_3, %c0_4, %c0_5, %c0_6] : memref<2x3x8x128xi8, #tpu.memory_space<vmem>>, vector<2x3x8x128xi8>
    %2 = vector.extract_strided_slice %0 {offsets = [0, 0, 0, 0], sizes = [2, 1, 8, 128], strides = [1, 1, 1, 1]} : vector<2x3x8x128xf32> to vector<2x1x8x128xf32>
    %3 = vector.shape_cast %2 : vector<2x1x8x128xf32> to vector<2x8x128xf32>
    %4 = vector.extract_strided_slice %0 {offsets = [0, 1, 0, 0], sizes = [2, 1, 8, 128], strides = [1, 1, 1, 1]} : vector<2x3x8x128xf32> to vector<2x1x8x128xf32>
    %5 = vector.shape_cast %4 : vector<2x1x8x128xf32> to vector<2x8x128xf32>
    %6 = vector.extract_strided_slice %0 {offsets = [0, 2, 0, 0], sizes = [2, 1, 8, 128], strides = [1, 1, 1, 1]} : vector<2x3x8x128xf32> to vector<2x1x8x128xf32>
    %7 = vector.shape_cast %6 : vector<2x1x8x128xf32> to vector<2x8x128xf32>
    %8 = arith.maximumf %3, %5 : vector<2x8x128xf32>
    %9 = arith.maximumf %8, %7 : vector<2x8x128xf32>
    %10 = arith.subf %3, %9 : vector<2x8x128xf32>
    %11 = math.exp %10 : vector<2x8x128xf32>
    %12 = arith.subf %5, %9 : vector<2x8x128xf32>
    %13 = math.exp %12 : vector<2x8x128xf32>
    %14 = arith.subf %7, %9 : vector<2x8x128xf32>
    %15 = math.exp %14 : vector<2x8x128xf32>
    %16 = arith.addf %11, %13 : vector<2x8x128xf32>
    %17 = arith.addf %16, %15 : vector<2x8x128xf32>
    %18 = vector.extract_strided_slice %1 {offsets = [0, 0, 0, 0], sizes = [2, 1, 8, 128], strides = [1, 1, 1, 1]} : vector<2x3x8x128xi8> to vector<2x1x8x128xi8>
    %19 = vector.shape_cast %18 : vector<2x1x8x128xi8> to vector<2x8x128xi8>
    %c0_i8 = arith.constant 0 : i8
    %20 = vector.broadcast %c0_i8 : i8 to vector<2x8x128xi8>
    %21 = arith.cmpi ne, %19, %20 : vector<2x8x128xi8>
    %cst = arith.constant 0.000000e+00 : f32
    %22 = vector.broadcast %cst : f32 to vector<2x8x128xf32>
    %23 = arith.select %21, %11, %22 : vector<2x8x128xi1>, vector<2x8x128xf32>
    %24 = vector.extract_strided_slice %1 {offsets = [0, 1, 0, 0], sizes = [2, 1, 8, 128], strides = [1, 1, 1, 1]} : vector<2x3x8x128xi8> to vector<2x1x8x128xi8>
    %25 = vector.shape_cast %24 : vector<2x1x8x128xi8> to vector<2x8x128xi8>
    %c0_i8_7 = arith.constant 0 : i8
    %26 = vector.broadcast %c0_i8_7 : i8 to vector<2x8x128xi8>
    %27 = arith.cmpi ne, %25, %26 : vector<2x8x128xi8>
    %cst_8 = arith.constant 0.000000e+00 : f32
    %28 = vector.broadcast %cst_8 : f32 to vector<2x8x128xf32>
    %29 = arith.select %27, %13, %28 : vector<2x8x128xi1>, vector<2x8x128xf32>
    %30 = arith.addf %23, %29 : vector<2x8x128xf32>
    %31 = vector.extract_strided_slice %1 {offsets = [0, 2, 0, 0], sizes = [2, 1, 8, 128], strides = [1, 1, 1, 1]} : vector<2x3x8x128xi8> to vector<2x1x8x128xi8>
    %32 = vector.shape_cast %31 : vector<2x1x8x128xi8> to vector<2x8x128xi8>
    %c0_i8_9 = arith.constant 0 : i8
    %33 = vector.broadcast %c0_i8_9 : i8 to vector<2x8x128xi8>
    %34 = arith.cmpi ne, %32, %33 : vector<2x8x128xi8>
    %cst_10 = arith.constant 0.000000e+00 : f32
    %35 = vector.broadcast %cst_10 : f32 to vector<2x8x128xf32>
    %36 = arith.select %34, %15, %35 : vector<2x8x128xi1>, vector<2x8x128xf32>
    %37 = arith.addf %30, %36 : vector<2x8x128xf32>
    %38 = tpu.reciprocal %17 : vector<2x8x128xf32> -> vector<2x8x128xf32>
    %39 = arith.mulf %37, %38 : vector<2x8x128xf32>
    %cst_11 = arith.constant dense<0.000000e+00> : vector<8x128xf32>
    %40 = vector.multi_reduction <add>, %39, %cst_11 [0] : vector<2x8x128xf32> to vector<8x128xf32>
    %41 = vector.shape_cast %40 : vector<8x128xf32> to vector<1x8x128xf32>
    %cst_12 = arith.constant dense<0.000000e+00> : vector<8x128xf32>
    %42 = vector.multi_reduction <add>, %41, %cst_12 [0] : vector<1x8x128xf32> to vector<8x128xf32>
    %43 = vector.shape_cast %42 : vector<8x128xf32> to vector<1x1x8x128xf32>
    %c0_13 = arith.constant 0 : index
    %c0_14 = arith.constant 0 : index
    %c0_15 = arith.constant 0 : index
    %c0_16 = arith.constant 0 : index
    %44 = vector.load %arg4[%c0_13, %c0_14, %c0_15, %c0_16] : memref<1x1x8x128xf32, #tpu.memory_space<vmem>>, vector<1x1x8x128xf32>
    tpu.vector_store %arg4[%c0_13, %c0_14, %c0_15, %c0_16], %43 {strides = array<i32>} : memref<1x1x8x128xf32, #tpu.memory_space<vmem>>, vector<1x1x8x128xf32>,
    return
  }
  func.func @transform_0(%arg0: i32, %arg1: i32) -> (i32, i32, i32, i32) {
    %c0_i32 = arith.constant 0 : i32
    %c0_i32_0 = arith.constant 0 : i32
    %c0_i32_1 = arith.constant 0 : i32
    return %arg0, %c0_i32, %arg1, %c0_i32_0 : i32, i32, i32, i32
  }
  func.func @transform_1(%arg0: i32, %arg1: i32) -> (i32, i32, i32, i32) {
    %c0_i32 = arith.constant 0 : i32
    %c0_i32_0 = arith.constant 0 : i32
    %c0_i32_1 = arith.constant 0 : i32
    return %arg0, %c0_i32, %arg1, %c0_i32_0 : i32, i32, i32, i32
  }
  func.func @transform_2(%arg0: i32, %arg1: i32) -> (i32, i32, i32, i32) {
    %c0_i32 = arith.constant 0 : i32
    %c0_i32_0 = arith.constant 0 : i32
    %c0_i32_1 = arith.constant 0 : i32
    return %arg0, %arg1, %c0_i32, %c0_i32_0 : i32, i32, i32, i32
  }
}

</mosaic_0001>

<bundles_post_ra>
// kernel: focal_tversky_loss.1
= control target key start
LH: loop header
LB: loop body
LE: loop exit
PB: predicated region body
PF: predicated region fallthrough
CT: control target
= control target key end

     0   :  { %v113_v28 = vmov 0   ;;  %s180_s0 = inlined_call_operand.vmem [shape: f32[2,3,8,128], index: 0, kind: input, shape index: {}]   ;;  %s181_s1 = inlined_call_operand.vmem [shape: s8[2,3,8,128], index: 1, kind: input, shape index: {}]   ;;  %s182_s2 = inlined_call_operand.vmem [shape: f32[1,1,8,128], index: 2, kind: output, shape index: {}]  }
   0x1   :  { %v13_v0 = vld [vmem:[%s180_s0] sm:$0xff]  ;;  %v14_v1 = vld [vmem:[%s180_s0 + $0x8] sm:$0xff]  ;;  %v15_v2 = vld [vmem:[%s180_s0 + $0x10] sm:$0xff] }
   0x2   :  { %v16_v3 = vld [vmem:[%s180_s0 + $0x18] sm:$0xff]  ;;  %v17_v4 = vld [vmem:[%s180_s0 + $0x20] sm:$0xff]  ;;  %v18_v5 = vld [vmem:[%s180_s0 + $0x28] sm:$0xff]  ;;  %v25_v6 = vmax.f32 %v13_v0, %v14_v1 }
   0x3   :  { %v26_v7 = vmax.f32 %v16_v3, %v17_v4  ;;  %v19_v21 = vld [vmem:[%s181_s1] sm:$0x3]  ;;  %v20_v22 = vld [vmem:[%s181_s1 + $0x2] sm:$0x3]  ;;  %v22_v24 = vld [vmem:[%s181_s1 + $0x6] sm:$0x3] }
   0x4   :  { %v27_v8 = vmax.f32 %v25_v6, %v15_v2  ;;  %v23_v25 = vld [vmem:[%s181_s1 + $0x8] sm:$0x3]  ;;  %vm51_vm0 = vnez %v19_v21  ;;  %vm61_vm1 = vnez %v20_v22  ;;  %v21_v26 = vld [vmem:[%s181_s1 + $0x4] sm:$0x3]  ;;  %vm52_vm2 = vnez %v22_v24  ;;  %v24_v27 = vld [vmem:[%s181_s1 + $0xa] sm:$0x3] }
   0x5   :  { %v28_v9 = vmax.f32 %v26_v7, %v18_v5  ;;  %vm62_vm3 = vnez %v23_v25  ;;  %v53_v29 = vsel %vm51_vm0, 16843009, %v113_v28  ;;  %v63_v30 = vsel %vm61_vm1, 16843009, %v113_v28 }
   0x6   :  { %v29_v10 = vsub.f32 %v13_v0, %v27_v8  ;;  %v35_v11 = vsub.f32 %v14_v1, %v27_v8  ;;  %v41_v12 = vsub.f32 %v15_v2, %v27_v8  ;;  %v54_v31 = vsel %vm52_vm2, 16843009, %v113_v28 }
   0x7   :  { %v30_v13 = vsub.f32 %v16_v3, %v28_v9  ;;  %v36_v14 = vsub.f32 %v17_v4, %v28_v9  ;;  %v42_v15 = vsub.f32 %v18_v5, %v28_v9  ;;  %v64_v32 = vsel %vm62_vm3, 16843009, %v113_v28 }
   0x8   :  { %v31_v16 = vmul.f32 1.442695, %v29_v10  ;;  %v37_v17 = vmul.f32 1.442695, %v35_v11  ;;  %v43_v20 = vmul.f32 1.442695, %v41_v12  ;;  %vm73_vm4 = vnez %v21_v26 }
   0x9   :  { %v33_v18 = vmul.f32 1.442695, %v30_v13  ;;  %v39_v19 = vmul.f32 1.442695, %v36_v14  ;;  %v45_v23 = vmul.f32 1.442695, %v42_v15  ;;  %vm74_vm5 = vnez %v24_v27 }
   0xa   :  { %97 = vpow2.f32 %v31_v16  ;;  %v55_v34 = vunpack.c.0.s8 %v53_v29  ;;  %v65_v35 = vunpack.c.0.s8 %v63_v30  ;;  %v56_v37 = vunpack.c.0.s8 %v54_v31 }
   0xb   :  { %99 = vpow2.f32 %v33_v18  ;;  %v66_v38 = vunpack.c.0.s8 %v64_v32  ;;  %v75_v39 = vsel %vm73_vm4, 16843009, %v113_v28  ;;  %v76_v41 = vsel %vm74_vm5, 16843009, %v113_v28 }
   0xc   :  { %101 = vpow2.f32 %v37_v17  ;;  %vm165_vm6 = vcmp.ne.s32.totalorder %v55_v34, 0  ;;  %vm169_vm7 = vcmp.ne.s32.totalorder %v65_v35, 0  ;;  %v77_v48 = vunpack.c.0.s8 %v75_v39 }
   0xd   :  { %103 = vpow2.f32 %v39_v19  ;;  %vm58_vm8 = vcmp.ne.s32.totalorder %v56_v37, 0  ;;  %vm68_vm9 = vcmp.ne.s32.totalorder %v66_v38, 0  ;;  %v78_v51 = vunpack.c.0.s8 %v76_v41 }
   0xe   :  { %105 = vpow2.f32 %v43_v20  ;;  %vm79_vm10 = vcmp.ne.s32.totalorder %v77_v48, 0 }
   0xf   :  { %107 = vpow2.f32 %v45_v23  ;;  %vm80_vm11 = vcmp.ne.s32.totalorder %v78_v51, 0 }
  0x14   :  { %v98_v33 = vpop.eup %97 }
  0x15   :  { %v100_v36 = vpop.eup %99  ;;  %v59_v53 = vsel %vm165_vm6, %v98_v33, 0.0 }
  0x16   :  { %v102_v40 = vpop.eup %101  ;;  %v60_v55 = vsel %vm58_vm8, %v100_v36, 0.0 }
  0x17   :  { %v104_v42 = vpop.eup %103  ;;  %v47_v43 = vadd.f32 %v102_v40, %v98_v33  ;;  %v69_v54 = vsel %vm169_vm7, %v102_v40, 0.0 }
  0x18   :  { %v106_v44 = vpop.eup %105  ;;  %v48_v45 = vadd.f32 %v104_v42, %v100_v36  ;;  %v70_v56 = vsel %vm68_vm9, %v104_v42, 0.0  ;;  %v71_v57 = vadd.f32 %v69_v54, %v59_v53 }
  0x19   :  { %v108_v49 = vpop.eup %107  ;;  %v49_v50 = vadd.f32 %v106_v44, %v47_v43  ;;  %v72_v58 = vadd.f32 %v70_v56, %v60_v55  ;;  %v81_v59 = vsel %vm79_vm10, %v106_v44, 0.0 }
  0x1a   :  { %v50_v52 = vadd.f32 %v108_v49, %v48_v45  ;;  %v82_v60 = vsel %vm80_vm11, %v108_v49, 0.0  ;;  %v83_v61 = vadd.f32 %v81_v59, %v71_v57 }
  0x1b   :  { %109 = vrcp.f32 %v49_v50  ;;  %v84_v62 = vadd.f32 %v82_v60, %v72_v58 }
  0x1c   :  { %111 = vrcp.f32 %v50_v52 }
  0x25   :  { %v110_v63 = vpop.eup %109 }
  0x26   :  { %v112_v0 = vpop.eup %111  ;;  %v87_v1 = vmul.f32 %v110_v63, %v83_v61 }
  0x27   :  { %v88_v2 = vmul.f32 %v112_v0, %v84_v62 }
  0x29   :  { %v89_v3 = vadd.f32 %v88_v2, %v87_v1 }
  0x2b   :  { %91 = vst [vmem:[%s182_s2] sm:$0xff] %v89_v3 }

</bundles_post_ra>
